<compile_context>
chip_gen: v5e
topology: v5e:2x2
jax: 0.10.0
libtpu: 0.0.40
codegen_flags: <defaults>
</compile_context>

<pallas_src>
import functools

import jax
import jax.numpy as jnp
from jax.experimental import pallas as pl
from jax.experimental.pallas import tpu as pltpu


def _nearest_interp_kernel(x_ref, o_ref, *, ratio):
    # x_ref: (1, t_tile, C)
    # o_ref: (1, t_tile, ratio * C)   with  o[0, t, r*C + c] = x[0, t, c]
    #
    # Repeats are folded into the lane dimension, so when C is a multiple of
    # 128 this is full-vreg copies + unmasked lane-dense stores only.
    o_ref[...] = jnp.tile(x_ref[...], (1, 1, ratio))


def nearest_interpolate(x: jax.Array, ratio: int) -> jax.Array:
    """Nearest-neighbor upsample along the time axis by `ratio`.

    Args:
        x: (batch_size, time_steps, classes_num)
    Returns:
        (batch_size, time_steps * ratio, classes_num)
    """
    batch_size, time_steps, classes_num = x.shape
    dtype_bytes = jnp.dtype(x.dtype).itemsize

    # Pick the largest time tile that comfortably fits a conservative VMEM
    # budget (double-buffered input + output tiles; the output is ratio x the
    # input, so it dominates).  Keep it a multiple of 8 sublanes, cap at 1024.
    bytes_per_time_row = 2 * (1 + ratio) * classes_num * dtype_bytes
    vmem_budget = 8 * 1024 * 1024  # well inside the 32 MiB scoped default / v7x 64 MiB
    max_rows = max(8, min(1024, (vmem_budget // bytes_per_time_row) // 8 * 8))
    t_tile = time_steps if time_steps <= max_rows else max_rows
    grid_t = pl.cdiv(time_steps, t_tile)

    folded = pl.pallas_call(
        functools.partial(_nearest_interp_kernel, ratio=ratio),
        out_shape=jax.ShapeDtypeStruct(
            (batch_size, time_steps, ratio * classes_num), x.dtype
        ),
        grid_spec=pltpu.PrefetchScalarGridSpec(
            num_scalar_prefetch=0,
            grid=(batch_size, grid_t),
            in_specs=[
                pl.BlockSpec((1, t_tile, classes_num), lambda b, t: (b, t, 0)),
            ],
            out_specs=pl.BlockSpec(
                (1, t_tile, ratio * classes_num), lambda b, t: (b, t, 0)
            ),
        ),
        compiler_params=pltpu.CompilerParams(
            dimension_semantics=("parallel", "parallel")
        ),
    )(x)

    # (B, T, ratio*C) -> (B, T*ratio, C): element ordering is identical, so
    # this reshape is contiguous (free) in the wrapper.
    return folded.reshape(batch_size, time_steps * ratio, classes_num)


def interpolate(x: jax.Array, ratio: int, interpolate_mode: str = "nearest") -> jax.Array:
    """Pallas equivalent of Interpolator.forward (default mode: 'nearest')."""
    if interpolate_mode == "nearest":
        return nearest_interpolate(x, ratio)
    # TODO(synk): 'linear' mode (conv_transpose1d with triangular kernel) has no
    # Pallas implementation here; only the default 'nearest' path is provided.
    raise NotImplementedError(f"interpolate_mode={interpolate_mode!r} not implemented")


if __name__ == "__main__":
    # Interpolator has no learned parameters; only `ratio` (+ mode).
    ratio = 4
    # Small but lane-aligned shapes: C=128 keeps every store unmasked/lane-dense.
    batch_size, time_steps, classes_num = 2, 32, 128

    key = jax.random.PRNGKey(0)
    x = jax.random.normal(
        key, (batch_size, time_steps, classes_num), dtype=jnp.float32
    )

    out = interpolate(x, ratio, interpolate_mode="nearest")
    out = jax.block_until_ready(out)

    # Reference (pure JAX, mirrors the PyTorch repeat+reshape exactly).
    ref = jnp.broadcast_to(
        x[:, :, None, :], (batch_size, time_steps, ratio, classes_num)
    ).reshape(batch_size, time_steps * ratio, classes_num)

    assert out.shape == (batch_size, time_steps * ratio, classes_num), out.shape
    assert out.dtype == x.dtype
    assert jnp.array_equal(out, ref), "mismatch vs reference"

    print("KERNEL_OK")
</pallas_src>

<mosaic_0001>
module attributes {stable_mosaic.version = 11 : i64} {
  func.func @_nearest_interp_kernel(%arg0: i32, %arg1: i32, %arg2: memref<1x32x128xf32, #tpu.memory_space<vmem>>, %arg3: memref<1x32x512xf32, #tpu.memory_space<vmem>>) attributes {dimension_semantics = [#tpu.dimension_semantics<parallel>, #tpu.dimension_semantics<parallel>], iteration_bounds = array<i64: 2, 1>, scalar_prefetch = 0 : i64, scratch_operands = 0 : i64, tpu.core_type = #tpu.core_type<tc>, window_params = [{transform_indices = @transform_0, window_bounds = array<i64: 1, 32, 128>}, {transform_indices = @transform_1, window_bounds = array<i64: 1, 32, 512>}]} {
    %c0 = arith.constant 0 : index
    %c0_0 = arith.constant 0 : index
    %c0_1 = arith.constant 0 : index
    %0 = vector.load %arg2[%c0, %c0_0, %c0_1] : memref<1x32x128xf32, #tpu.memory_space<vmem>>, vector<1x32x128xf32>
    %1 = tpu.concatenate %0, %0, %0, %0 in 2 : vector<1x32x128xf32>, vector<1x32x128xf32>, vector<1x32x128xf32>, vector<1x32x128xf32> -> vector<1x32x512xf32>
    %c0_2 = arith.constant 0 : index
    %c0_3 = arith.constant 0 : index
    %c0_4 = arith.constant 0 : index
    %2 = vector.load %arg3[%c0_2, %c0_3, %c0_4] : memref<1x32x512xf32, #tpu.memory_space<vmem>>, vector<1x32x512xf32>
    tpu.vector_store %arg3[%c0_2, %c0_3, %c0_4], %1 {strides = array<i32>} : memref<1x32x512xf32, #tpu.memory_space<vmem>>, vector<1x32x512xf32>,
    return
  }
  func.func @transform_0(%arg0: i32, %arg1: i32) -> (i32, i32, i32) {
    %c0_i32 = arith.constant 0 : i32
    %c0_i32_0 = arith.constant 0 : i32
    return %arg0, %arg1, %c0_i32 : i32, i32, i32
  }
  func.func @transform_1(%arg0: i32, %arg1: i32) -> (i32, i32, i32) {
    %c0_i32 = arith.constant 0 : i32
    %c0_i32_0 = arith.constant 0 : i32
    return %arg0, %arg1, %c0_i32 : i32, i32, i32
  }
}

</mosaic_0001>

<bundles_post_ra>
// kernel: tpu_custom_call.1
= control target key start
LH: loop header
LB: loop body
LE: loop exit
PB: predicated region body
PF: predicated region fallthrough
CT: control target
= control target key end

     0   :  { %6 = vsyncpa [#allocation3], 0  ;;  %s615_s0 = inlined_call_operand.hbm [shape: f32[2,32,128], index: 0, kind: input, shape index: {}]   ;;  %s616_s1 = inlined_call_operand.hbm [shape: f32[2,32,512], index: 1, kind: output, shape index: {}]  }
   0x1   :  { %8 = vsyncpa [#allocation3 + $0x1], 0 }
   0x2   :  { %9 = vsyncpa [#allocation4], 0 }
   0x3   :  { %11 = vsyncpa [#allocation4 + $0x1], 0  ;;  %s494_s6 = smov 0   ;;  %s496_s7 = smov 0  }
   0x4   :  { %s498_s8 = smov 0   ;;  %s500_s9 = smov 0  }
   0x5   :  { %s502_s10 = smov 0   ;;  %s504_s11 = smov 0  }
   0x6 LB: > { %s283_s12 = sadd.s32 4294967295, %s478_s11   ;;  %s284_s13 = sadd.s32 4294967294, %s478_s11   ;;  %s478_s11 = sphi %s504_s11, %s17_s11   ;;  %s474_s10 = sphi %s502_s10, %s625_s10   ;;  %s470_s9 = sphi %s500_s9, %s624_s9   ;;  %s466_s8 = sphi %s498_s8, %s623_s8   ;;  %s462_s7 = sphi %s496_s7, %s622_s7   ;;  %s458_s6 = sphi %s494_s6, %s621_s6  }
   0x7   : > { %s29_s14 = sadd.s32 1, %s474_s10  ;;  %s38_s15 = sadd.s32 1, %s466_s8 }
   0x8   : > { %p31_p0 = scmp.ge.s32.totalorder %s29_s14, 2  ;;  %p45_p1 = scmp.ne.s32.totalorder %s466_s8, %s462_s7 }
   0x9   : > { %p46_p2 = scmp.eq.s32.totalorder %s478_s11, 0  ;;  %p51_p3 = scmp.ne.s32.totalorder %s462_s7, %s458_s6 }
   0xa   : > { %s627_s14 = smov (%p31_p0, %s29_s14), 0  ;;  %p52_p5 = scmp.eq.s32.totalorder %s283_s12, 0 }
   0xb   : > { %p535_p4 = por %p46_p2, %p45_p1  ;;  %s33_s17 = ssub.s32 %s474_s10, %s627_s14 }
   0xc   : > { %p77_p6 = scmp.eq.s32.totalorder %s283_s12, 1  ;;  %p36_p7 = scmp.eq.s32.totalorder %s33_s17, 0 }
   0xd   : > { %p541_p8 = por %p52_p5, %p51_p3  ;;  %p83_p10 = scmp.eq.s32.totalorder %s284_s13, 1 }
   0xe   : > { %p545_p9 = por %p77_p6, %p45_p1  ;;  %p286_p12 = scmp.ge.s32.totalorder %s478_s11, 2 }
   0xf   : > { %s550_s20 = scalar_select %p36_p7, %s466_s8, %s38_s15  }
  0x10   : > { %p552_p11 = por %p83_p10, %p51_p3  ;;  %p312_p13 = scmp.lt.s32.totalorder %s478_s11, 2 }
  0x11   : > { %s103_s22 = sand.u32 1, %s466_s8   ;;  %s298_s24 = sshll.u32 %s474_s10, 5 }
  0x12   : > { %s287_s23 = sshll.u32 %s103_s22, 5  ;;  %s114_s27 = scalar_lea.hbm %s615_s0, %s298_s24 }
  0x13   : > { %s107_s28 = scalar_lea.vmem [#allocation2], %s287_s23  ;;  %s115_s30 = sshll.u32 %s114_s27, 4  ;;  %s116_s30 = int_to_ptr.hbm [resolvable:$true] %s115_s30 }
  0x14   : > { %s117_s29 = sshll.u32 %s107_s28, 4  ;;  %p305_p0 = pnand %p312_p13, %p535_p4  ;;  %s118_s29 = int_to_ptr.vmem [resolvable:$true] %s117_s29 }
  0x15   : > { %p290_p1 = scmp.ge.s32.totalorder %s478_s11, 1  ;;  %s104_s2 = scalar_lea.sflag [#allocation3], %s103_s22 }
  0x16   : > { %s480_s3 = smov 128   ;;  %s481_s4 = smov 8  }
  0x17   : > { %307 = dma.hbm_to_vmem [thread:$0]  (!%p305_p0), %s116_s30, 512, %s118_s29, %s104_s2, %s480_s3, %s480_s3, %s481_s4  }
  0x18   : > { %p125_p2 = scmp.lt.s32.totalorder %s478_s11, 3 }
  0x1a   : > { %p126_p3 = pnand %p290_p1, %p125_p2 }
  0x1b   : > { %s568_s5 = sand.u32 (!%p126_p3), 1, %s462_s7  }
  0x1c   : > { %129 = sbr.rel (%p126_p3) target bundleno = 55 (0x37), region = 24  ;;  %s291_s12 = sshll.u32 (!%p126_p3), %s568_s5, 5 }
  0x1d   : > { %s132_s13 = scalar_lea.sflag (!%p126_p3), [#allocation3], %s568_s5  ;;  %s135_s15 = scalar_lea.vmem (!%p126_p3), [#allocation2], %s291_s12 }
  0x21   : > { %449 = dma.done.wait (%p541_p8), %s132_s13, 512  }
  0x22   : > { %451 = vsyncadd (%p541_p8), %s132_s13, 4294966784  ;;  %s292_s16 = sshll.u32 %s568_s5, 7  ;;  %v157_v0 = vld [vmem:[%s135_s15] sm:$0xff]  ;;  %v158_v1 = vld [vmem:[%s135_s15 + $0x8] sm:$0xff]  ;;  %s299_s22 = sshll.u32 %s470_s9, 7 }
  0x23   : > { %s154_s17 = scalar_lea.vmem [#allocation5], %s292_s16  ;;  %v159_v2 = vld [vmem:[%s135_s15 + $0x10] sm:$0xff]  ;;  %s192_s18 = scalar_lea.hbm %s616_s1, %s299_s22  ;;  %v160_v3 = vld [vmem:[%s135_s15 + $0x18] sm:$0xff] }
  0x24   : > { %161 = vst [vmem:[%s154_s17] sm:$0xff] %v157_v0  ;;  %s193_s25 = sshll.u32 %s154_s17, 4  ;;  %s195_s26 = sshll.u32 %s192_s18, 4  ;;  %s194_s25 = int_to_ptr.vmem [resolvable:$true] %s193_s25  ;;  %s196_s26 = int_to_ptr.hbm [resolvable:$true] %s195_s26 }
  0x25   : > { %162 = vst [vmem:[%s154_s17 + $0x8] sm:$0xff] %v157_v0  ;;  %s178_s9 = scalar_lea.sflag [#allocation4], %s568_s5  ;;  %s410_s27 = sshra.s32 %s196_s26, 4  ;;  %s411_s27 = int_to_ptr.hbm [resolvable:$true] %s410_s27 }
  0x26   : > { %163 = vst [vmem:[%s154_s17 + $0x10] sm:$0xff] %v157_v0  ;;  %s412_s28 = scalar_lea.hbm %s411_s27, 128  ;;  %s416_s2 = scalar_lea.hbm %s616_s1, 256 }
  0x27   : > { %164 = vst [vmem:[%s154_s17 + $0x18] sm:$0xff] %v157_v0  ;;  %p413_p4 = scmp.ne.s32.totalorder %s411_s27, %s412_s28  ;;  %p417_p7 = scmp.lt.s32.totalorder %s411_s27, %s616_s1 }
  0x28   : > { %165 = vst [vmem:[%s154_s17 + $0x20] sm:$0xff] %v158_v1  ;;  %p418_p8 = scmp.lt.s32.totalorder %s416_s2, %s412_s28 }
  0x29   : > { %166 = vst [vmem:[%s154_s17 + $0x28] sm:$0xff] %v158_v1  ;;  %p414_p5 = pnand %p413_p4, %p545_p9 }
  0x2a   : > { %167 = vst [vmem:[%s154_s17 + $0x30] sm:$0xff] %v158_v1  ;;  %p419_p10 = por %p418_p8, %p417_p7 }
  0x2b   : > { %168 = vst [vmem:[%s154_s17 + $0x38] sm:$0xff] %v158_v1  ;;  %p415_p6 = pneg %p414_p5 }
  0x2c   : > { %169 = vst [vmem:[%s154_s17 + $0x40] sm:$0xff] %v159_v2 }
  0x2d   : > { %170 = vst [vmem:[%s154_s17 + $0x48] sm:$0xff] %v159_v2  ;;  %p420_p13 = pnand %p419_p10, %p415_p6 }
  0x2e   : > { %171 = vst [vmem:[%s154_s17 + $0x50] sm:$0xff] %v159_v2 }
  0x2f   : > { %172 = vst [vmem:[%s154_s17 + $0x58] sm:$0xff] %v159_v2 }
  0x30   : > { %173 = vst [vmem:[%s154_s17 + $0x60] sm:$0xff] %v160_v3 }
  0x31   : > { %174 = vst [vmem:[%s154_s17 + $0x68] sm:$0xff] %v160_v3 }
  0x32   : > { %175 = vst [vmem:[%s154_s17 + $0x70] sm:$0xff] %v160_v3 }
  0x33   : > { %176 = vst [vmem:[%s154_s17 + $0x78] sm:$0xff] %v160_v3 }
  0x34   : > { %423 = shalt.err (!%p420_p13)
}
  0x35   : > { %s482_s5 = smov 512   ;;  %s483_s12 = smov 32  }
  0x36   : > { %302 = dma.vmem_to_hbm [thread:$0]  (%p545_p9), %s194_s25, 2048, %s196_s26, %s178_s9, %s482_s5, %s482_s5, %s483_s12  }
  0x37 PF: > { %s210_s13 = sand.u32 1, %s458_s6   ;;  %p309_p0 = pnand %p286_p12, %p552_p11 }
  0x38   : > { %s211_s15 = scalar_lea.sflag [#allocation4], %s210_s13 }
  0x39   : > { %p310_p1 = pneg %p309_p0 }
  0x3b   : > { %453 = dma.done.wait (%p310_p1), %s211_s15, 2048  }
  0x3c   : > { %455 = vsyncadd (%p310_p1), %s211_s15, 4294965248  ;;  %s17_s11 = sadd.s32 1, %s478_s11   ;;  %s621_s6 = smov %s462_s7 }
  0x3d   : > { %p14_p2 = scmp.ge.s32.totalorder %s17_s11, 4   ;;  %s622_s7 = smov %s466_s8 }
  0x3e   : > { %s623_s8 = smov %s550_s20  ;;  %s624_s9 = smov %s474_s10 }
  0x3f   : > { %s625_s10 = smov %s627_s14  ;;  %16 = sbr.rel (!%p14_p2) target bundleno = 6 (0x6), region = 69 }
  0x44   :  { %217 = vsyncpa [#allocation3], 1 }
  0x45   :  { %219 = vsyncpa [#allocation3 + $0x1], 1 }
  0x46   :  { %220 = vsyncpa [#allocation4], 1 }
  0x47   :  { %222 = vsyncpa [#allocation4 + $0x1], 1 }

</bundles_post_ra>
